<compile_context>
chip_gen: v5e
topology: v5e:2x2
jax: 0.10.0
libtpu: 0.0.40
codegen_flags: <defaults>
</compile_context>

<pallas_src>
import jax
import jax.numpy as jnp
from jax.experimental import pallas as pl
from jax.experimental.pallas import tpu as pltpu

_MIB = 1024 * 1024


def _round_up(v, m):
    return ((v + m - 1) // m) * m


def _sublane_multiple(dtype):
    # f32 -> 8, bf16 -> 16, int8/fp8 -> 32 (sub-32-bit dtypes pack on sublanes).
    return {4: 8, 2: 16, 1: 32}.get(jnp.dtype(dtype).itemsize, 8)


def _vmem_capacity_bytes():
    try:
        return int(pltpu.get_tpu_info().vmem_capacity_bytes)
    except Exception:
        return 64 * _MIB  # conservative default (v7x has the smallest VMEM)


def _vmem_limit(needed_bytes):
    cap = _vmem_capacity_bytes()
    lim = max(2 * int(needed_bytes), 32 * _MIB)  # never below default limits
    return int(min(lim, cap - 8 * _MIB))         # leave physical headroom


# ---------------------------------------------------------------------------
# Kernel bodies
# ---------------------------------------------------------------------------
def _gating_kernel_rows(x_ref, w1_ref, w2_ref, b2_ref, bg_ref, o_ref):
    """Row-major: x block (tm, D_in), weight blocks (D_in, cols)."""
    x = x_ref[...]
    h1 = jnp.dot(x, w1_ref[...], preferred_element_type=jnp.float32)
    h2 = jnp.dot(x, w2_ref[...], preferred_element_type=jnp.float32)
    h2 = h2 + b2_ref[...].astype(jnp.float32)
    # sigmoid(h) == 0.5 * (tanh(0.5 * h) + 1): a single EUP push per element.
    out1 = 0.5 * (jnp.tanh(0.5 * h1) + 1.0)
    out2 = jnp.tanh(h2)
    o_ref[...] = (out1 + bg_ref[...].astype(jnp.float32) * out2).astype(o_ref.dtype)


def _gating_kernel_cols(xt_ref, w1t_ref, w2t_ref, b2_ref, bg_ref, o_ref):
    """Transposed (lane-dense) variant for small word_dim: x^T block (D, tn)."""
    xt = xt_ref[...]
    h1 = jnp.dot(w1t_ref[...], xt, preferred_element_type=jnp.float32)
    h2 = jnp.dot(w2t_ref[...], xt, preferred_element_type=jnp.float32)
    h2 = h2 + b2_ref[...].astype(jnp.float32)
    out1 = 0.5 * (jnp.tanh(0.5 * h1) + 1.0)
    out2 = jnp.tanh(h2)
    o_ref[...] = (out1 + bg_ref[...].astype(jnp.float32) * out2).astype(o_ref.dtype)


# ---------------------------------------------------------------------------
# word_dim < 128: lane-dense transposed problem (out^T = f(W^T x^T))
# ---------------------------------------------------------------------------
def _gating_small_dim(x2d, w1, w2, b2, bg):
    N, D = x2d.shape
    x_item = jnp.dtype(x2d.dtype).itemsize
    w_item = jnp.dtype(w1.dtype).itemsize

    # Row axis maps to lanes: multiple of 128, >=2 grid steps for mid-size N.
    if N <= 128:
        tn = 128
    else:
        tn = min(512, _round_up(pl.cdiv(N, 2), 128))

    xT = x2d.T                 # (D, N): wrapper-side layout plumbing
    n_pad = N
    if N < tn:                 # only pad when a single block exceeds the array
        n_pad = tn
        xT = jnp.pad(xT, ((0, 0), (0, tn - N)))
    grid = (pl.cdiv(n_pad, tn),)

    w1t = w1.T                 # (out, in) for the transposed contraction
    w2t = w2.T
    b2c = b2.reshape(D, 1).astype(jnp.float32)
    bgc = bg.reshape(D, 1).astype(jnp.float32)

    needed = (2 * D * tn * x_item          # x^T tile (double-buffered)
              + 2 * D * tn * x_item        # out tile (double-buffered)
              + 2 * D * D * w_item         # both weights (single-buffered)
              + 4 * D * tn * 4             # f32 intermediates h1/h2/out1/out2
              + 4 * D * 4)                 # bias / gate columns
    cost = pl.CostEstimate(
        flops=int(4 * N * D * D),
        transcendentals=int(2 * N * D),
        bytes_accessed=int(2 * N * D * x_item + 2 * D * D * w_item + 8 * D))

    def run(single_buffer):
        const_kwargs = dict(pipeline_mode=pl.Buffered(1)) if single_buffer else {}
        in_specs = [
            pl.BlockSpec((D, tn), lambda i: (0, i)),
            pl.BlockSpec((D, D), lambda i: (0, 0), **const_kwargs),
            pl.BlockSpec((D, D), lambda i: (0, 0), **const_kwargs),
            pl.BlockSpec((D, 1), lambda i: (0, 0), **const_kwargs),
            pl.BlockSpec((D, 1), lambda i: (0, 0), **const_kwargs),
        ]
        out_specs = pl.BlockSpec((D, tn), lambda i: (0, i))
        return pl.pallas_call(
            _gating_kernel_cols,
            out_shape=jax.ShapeDtypeStruct((D, n_pad), x2d.dtype),
            grid_spec=pltpu.PrefetchScalarGridSpec(
                num_scalar_prefetch=0, grid=grid,
                in_specs=in_specs, out_specs=out_specs),
            compiler_params=pltpu.CompilerParams(
                dimension_semantics=("parallel",),
                vmem_limit_bytes=_vmem_limit(needed)),
            cost_estimate=cost,
        )(xT, w1t, w2t, b2c, bgc)

    try:
        outT = run(True)
    except Exception:
        # Fallback if pipeline_mode=pl.Buffered(1) is unsupported on this JAX.
        outT = run(False)

    if n_pad != N:
        outT = outT[:, :N]
    return outT.T


# ---------------------------------------------------------------------------
# word_dim >= 128: row-major kernel (weights resident or column-tiled)
# ---------------------------------------------------------------------------
def _gating_large_dim(x2d, w1, w2, b2, bg):
    N, D = x2d.shape
    x_item = jnp.dtype(x2d.dtype).itemsize
    w_item = jnp.dtype(w1.dtype).itemsize
    sub = _sublane_multiple(x2d.dtype)

    # Pad the *output* dim to a lane multiple -> unmasked stores; slice later.
    Dp = _round_up(D, 128)
    w1p, w2p = w1, w2
    if Dp != D:
        w1p = jnp.pad(w1, ((0, 0), (0, Dp - D)))
        w2p = jnp.pad(w2, ((0, 0), (0, Dp - D)))
        b2 = jnp.pad(b2, (0, Dp - D))
        bg = jnp.pad(bg, (0, Dp - D))
    b2r = b2.reshape(1, Dp).astype(jnp.float32)
    bgr = bg.reshape(1, Dp).astype(jnp.float32)

    budget = _vmem_capacity_bytes() - 16 * _MIB

    def estimate(tm, cols, resident):
        w_bufs = 1 if resident else 2
        return (2 * tm * D * x_item            # x tile
                + 2 * tm * cols * x_item       # out tile
                + w_bufs * 2 * D * cols * w_item   # W1 + W2 blocks
                + 4 * tm * cols * 4            # f32 intermediates
                + 4 * cols * 4)                # b2 / bg

    # Row tile: >=2 grid steps when possible (megacore), capped at 512 rows.
    if N <= sub:
        tm0 = sub
    else:
        tm0 = max(sub, min(512, _round_up(pl.cdiv(N, 2), sub)))
    tm_candidates = sorted(
        {max(sub, (tm0 // k // sub) * sub) for k in (1, 2, 4, 8)}, reverse=True)

    plan = None
    for tm_c in tm_candidates:                       # prefer resident weights
        if estimate(tm_c, Dp, resident=True) <= budget:
            plan = ("resident", tm_c, Dp)
            break
    if plan is None:                                 # stream weight columns
        for tn_c in (512, 256, 128):
            tn_c = min(tn_c, Dp)
            for tm_c in tm_candidates + [sub]:
                if estimate(tm_c, tn_c, resident=False) <= budget:
                    plan = ("tiled", tm_c, tn_c)
                    break
            if plan is not None:
                break
    if plan is None:
        plan = ("tiled", sub, 128)                   # last resort

    mode, tm, tcols = plan

    n_pad = N
    if N < tm:                    # only pad when a single block exceeds the array
        tm = _round_up(N, sub)
        n_pad = tm
        x2d = jnp.pad(x2d, ((0, tm - N), (0, 0)))

    needed = estimate(tm, tcols, mode == "resident")
    cost = pl.CostEstimate(
        flops=int(4 * N * D * Dp),
        transcendentals=int(2 * N * Dp),
        bytes_accessed=int(N * D * x_item + 2 * D * Dp * w_item
                           + N * Dp * x_item + 8 * Dp))

    def run(single_buffer):
        const_kwargs = dict(pipeline_mode=pl.Buffered(1)) if single_buffer else {}
        if mode == "resident":
            grid = (pl.cdiv(n_pad, tm),)
            in_specs = [
                pl.BlockSpec((tm, D), lambda i: (i, 0)),
                pl.BlockSpec((D, Dp), lambda i: (0, 0), **const_kwargs),
                pl.BlockSpec((D, Dp), lambda i: (0, 0), **const_kwargs),
                pl.BlockSpec((1, Dp), lambda i: (0, 0), **const_kwargs),
                pl.BlockSpec((1, Dp), lambda i: (0, 0), **const_kwargs),
            ]
            out_specs = pl.BlockSpec((tm, Dp), lambda i: (i, 0))
            dims = ("parallel",)
        else:
            tn = tcols
            grid = (pl.cdiv(n_pad, tm), pl.cdiv(Dp, tn))
            in_specs = [
                pl.BlockSpec((tm, D), lambda i, j: (i, 0)),
                pl.BlockSpec((D, tn), lambda i, j: (0, j)),
                pl.BlockSpec((D, tn), lambda i, j: (0, j)),
                pl.BlockSpec((1, tn), lambda i, j: (0, j)),
                pl.BlockSpec((1, tn), lambda i, j: (0, j)),
            ]
            out_specs = pl.BlockSpec((tm, tn), lambda i, j: (i, j))
            dims = ("parallel", "parallel")
        return pl.pallas_call(
            _gating_kernel_rows,
            out_shape=jax.ShapeDtypeStruct((n_pad, Dp), x2d.dtype),
            grid_spec=pltpu.PrefetchScalarGridSpec(
                num_scalar_prefetch=0, grid=grid,
                in_specs=in_specs, out_specs=out_specs),
            compiler_params=pltpu.CompilerParams(
                dimension_semantics=dims,
                vmem_limit_bytes=_vmem_limit(needed)),
            cost_estimate=cost,
        )(x2d, w1p, w2p, b2r, bgr)

    try:
        out = run(True)
    except Exception:
        # Fallback if pipeline_mode=pl.Buffered(1) is unsupported on this JAX.
        out = run(False)

    if n_pad != N:
        out = out[:N]
    if Dp != D:
        out = out[:, :D]
    return out


# ---------------------------------------------------------------------------
# Public wrapper
# ---------------------------------------------------------------------------
def gating_machine(x, w1, w2, b2, bg):
    """x: (..., D). w1, w2: (D, D) in (in, out) orientation (= nn.Linear W^T).
    b2, bg: (D,). Returns sigmoid(x@w1) + bg * tanh(x@w2 + b2)."""
    orig_shape = x.shape
    D = orig_shape[-1]
    x2d = x.reshape(-1, D)
    if D < 128:
        out2d = _gating_small_dim(x2d, w1, w2, b2, bg)
    else:
        out2d = _gating_large_dim(x2d, w1, w2, b2, bg)
    return out2d.reshape(orig_shape)


def reference(x, w1, w2, b2, bg):
    out1 = jax.nn.sigmoid(x @ w1)
    out2 = jnp.tanh(x @ w2 + b2)
    return out1 + bg * out2


if __name__ == "__main__":
    key = jax.random.PRNGKey(0)
    (k_x, k_w1, k_w2, k_b2, k_bg,
     k_x2, k_w3, k_w4, k_b3, k_bg2) = jax.random.split(key, 10)

    # Small word_dim (D=32): exercises the lane-dense transposed path.
    batch, seq, word_dim = 2, 8, 32
    x = jax.random.normal(k_x, (batch, seq, word_dim), dtype=jnp.float32)
    # nn.Linear weights are (out, in); stored transposed as (in, out).
    w1 = jax.random.normal(k_w1, (word_dim, word_dim), dtype=jnp.float32) * 0.1
    w2 = jax.random.normal(k_w2, (word_dim, word_dim), dtype=jnp.float32) * 0.1
    b2 = jax.random.normal(k_b2, (word_dim,), dtype=jnp.float32) * 0.1
    bg = jax.random.normal(k_bg, (word_dim,), dtype=jnp.float32)

    out = jax.block_until_ready(gating_machine(x, w1, w2, b2, bg))
    ref = reference(x, w1, w2, b2, bg)
    assert out.shape == x.shape
    assert jnp.allclose(out, ref, atol=2e-5, rtol=2e-5), "mismatch (D=32)"

    # Larger word_dim (D=256): exercises the row-major resident-weight path.
    word_dim2 = 256
    x2 = jax.random.normal(k_x2, (batch, seq, word_dim2), dtype=jnp.float32)
    w3 = jax.random.normal(k_w3, (word_dim2, word_dim2), dtype=jnp.float32) * 0.05
    w4 = jax.random.normal(k_w4, (word_dim2, word_dim2), dtype=jnp.float32) * 0.05
    b3 = jax.random.normal(k_b3, (word_dim2,), dtype=jnp.float32) * 0.1
    bg2 = jax.random.normal(k_bg2, (word_dim2,), dtype=jnp.float32)

    out2 = jax.block_until_ready(gating_machine(x2, w3, w4, b3, bg2))
    ref2 = reference(x2, w3, w4, b3, bg2)
    assert out2.shape == x2.shape
    assert jnp.allclose(out2, ref2, atol=2e-5, rtol=2e-5), "mismatch (D=256)"

    print("KERNEL_OK")
</pallas_src>

<mosaic_0001>
module attributes {stable_mosaic.version = 11 : i64} {
  func.func @_gating_kernel_cols(%arg0: i32, %arg1: memref<32x128xf32, #tpu.memory_space<vmem>>, %arg2: memref<32x32xf32, #tpu.memory_space<vmem>>, %arg3: memref<32x32xf32, #tpu.memory_space<vmem>>, %arg4: memref<32x1xf32, #tpu.memory_space<vmem>>, %arg5: memref<32x1xf32, #tpu.memory_space<vmem>>, %arg6: memref<32x128xf32, #tpu.memory_space<vmem>>) attributes {dimension_semantics = [#tpu.dimension_semantics<parallel>], iteration_bounds = array<i64: 1>, scalar_prefetch = 0 : i64, scratch_operands = 0 : i64, tpu.core_type = #tpu.core_type<tc>, window_params = [{transform_indices = @transform_0, window_bounds = array<i64: 32, 128>}, {pipeline_mode = #tpu.pipeline_mode<synchronous>, transform_indices = @transform_1, window_bounds = array<i64: 32, 32>}, {pipeline_mode = #tpu.pipeline_mode<synchronous>, transform_indices = @transform_2, window_bounds = array<i64: 32, 32>}, {pipeline_mode = #tpu.pipeline_mode<synchronous>, transform_indices = @transform_3, window_bounds = array<i64: 32, 1>}, {pipeline_mode = #tpu.pipeline_mode<synchronous>, transform_indices = @transform_4, window_bounds = array<i64: 32, 1>}, {transform_indices = @transform_5, window_bounds = array<i64: 32, 128>}]} {
    %c0 = arith.constant 0 : index
    %c0_0 = arith.constant 0 : index
    %0 = vector.load %arg1[%c0, %c0_0] : memref<32x128xf32, #tpu.memory_space<vmem>>, vector<32x128xf32>
    %c0_1 = arith.constant 0 : index
    %c0_2 = arith.constant 0 : index
    %1 = vector.load %arg2[%c0_1, %c0_2] : memref<32x32xf32, #tpu.memory_space<vmem>>, vector<32x32xf32>
    %cst = arith.constant dense<0.000000e+00> : vector<32x128xf32>
    %2 = tpu.matmul %1, %0, %cst {dimension_numbers = #tpu.dot_dimension_numbers<[1], [0], [0], [1], [0, 0, 1, 1], [], []>} : vector<32x32xf32>, vector<32x128xf32>, vector<32x128xf32> -> vector<32x128xf32>
    %c0_3 = arith.constant 0 : index
    %c0_4 = arith.constant 0 : index
    %3 = vector.load %arg3[%c0_3, %c0_4] : memref<32x32xf32, #tpu.memory_space<vmem>>, vector<32x32xf32>
    %cst_5 = arith.constant dense<0.000000e+00> : vector<32x128xf32>
    %4 = tpu.matmul %3, %0, %cst_5 {dimension_numbers = #tpu.dot_dimension_numbers<[1], [0], [0], [1], [0, 0, 1, 1], [], []>} : vector<32x32xf32>, vector<32x128xf32>, vector<32x128xf32> -> vector<32x128xf32>
    %c0_6 = arith.constant 0 : index
    %c0_7 = arith.constant 0 : index
    %5 = vector.load %arg4[%c0_6, %c0_7] : memref<32x1xf32, #tpu.memory_space<vmem>>, vector<32x1xf32>
    %6 = vector.broadcast %5 : vector<32x1xf32> to vector<32x128xf32>
    %7 = arith.addf %4, %6 : vector<32x128xf32>
    %cst_8 = arith.constant 5.000000e-01 : f32
    %8 = vector.broadcast %cst_8 : f32 to vector<32x128xf32>
    %9 = arith.mulf %8, %2 : vector<32x128xf32>
    %10 = math.tanh %9 : vector<32x128xf32>
    %cst_9 = arith.constant 1.000000e+00 : f32
    %11 = vector.broadcast %cst_9 : f32 to vector<32x128xf32>
    %12 = arith.addf %10, %11 : vector<32x128xf32>
    %cst_10 = arith.constant 5.000000e-01 : f32
    %13 = vector.broadcast %cst_10 : f32 to vector<32x128xf32>
    %14 = arith.mulf %13, %12 : vector<32x128xf32>
    %15 = math.tanh %7 : vector<32x128xf32>
    %c0_11 = arith.constant 0 : index
    %c0_12 = arith.constant 0 : index
    %16 = vector.load %arg5[%c0_11, %c0_12] : memref<32x1xf32, #tpu.memory_space<vmem>>, vector<32x1xf32>
    %17 = vector.broadcast %16 : vector<32x1xf32> to vector<32x128xf32>
    %18 = arith.mulf %17, %15 : vector<32x128xf32>
    %19 = arith.addf %14, %18 : vector<32x128xf32>
    %c0_13 = arith.constant 0 : index
    %c0_14 = arith.constant 0 : index
    %20 = vector.load %arg6[%c0_13, %c0_14] : memref<32x128xf32, #tpu.memory_space<vmem>>, vector<32x128xf32>
    tpu.vector_store %arg6[%c0_13, %c0_14], %19 {strides = array<i32>} : memref<32x128xf32, #tpu.memory_space<vmem>>, vector<32x128xf32>,
    return
  }
  func.func @transform_0(%arg0: i32) -> (i32, i32) {
    %c0_i32 = arith.constant 0 : i32
    %c0_i32_0 = arith.constant 0 : i32
    return %c0_i32, %arg0 : i32, i32
  }
  func.func @transform_1(%arg0: i32) -> (i32, i32) {
    %c0_i32 = arith.constant 0 : i32
    %c0_i32_0 = arith.constant 0 : i32
    %c0_i32_1 = arith.constant 0 : i32
    return %c0_i32, %c0_i32_0 : i32, i32
  }
  func.func @transform_2(%arg0: i32) -> (i32, i32) {
    %c0_i32 = arith.constant 0 : i32
    %c0_i32_0 = arith.constant 0 : i32
    %c0_i32_1 = arith.constant 0 : i32
    return %c0_i32, %c0_i32_0 : i32, i32
  }
  func.func @transform_3(%arg0: i32) -> (i32, i32) {
    %c0_i32 = arith.constant 0 : i32
    %c0_i32_0 = arith.constant 0 : i32
    %c0_i32_1 = arith.constant 0 : i32
    return %c0_i32, %c0_i32_0 : i32, i32
  }
  func.func @transform_4(%arg0: i32) -> (i32, i32) {
    %c0_i32 = arith.constant 0 : i32
    %c0_i32_0 = arith.constant 0 : i32
    %c0_i32_1 = arith.constant 0 : i32
    return %c0_i32, %c0_i32_0 : i32, i32
  }
  func.func @transform_5(%arg0: i32) -> (i32, i32) {
    %c0_i32 = arith.constant 0 : i32
    %c0_i32_0 = arith.constant 0 : i32
    return %c0_i32, %arg0 : i32, i32
  }
}

module attributes {stable_mosaic.version = 11 : i64} {
  func.func @_gating_kernel_cols(%arg0: i32, %arg1: memref<32x128xf32, #tpu.memory_space<vmem>>, %arg2: memref<32x32xf32, #tpu.memory_space<vmem>>, %arg3: memref<32x32xf32, #tpu.memory_space<vmem>>, %arg4: memref<32x1xf32, #tpu.memory_space<vmem>>, %arg5: memref<32x1xf32, #tpu.memory_space<vmem>>, %arg6: memref<32x128xf32, #tpu.memory_space<vmem>>) attributes {dimension_semantics = [#tpu.dimension_semantics<parallel>], iteration_bounds = array<i64: 1>, scalar_prefetch = 0 : i64, scratch_operands = 0 : i64, tpu.core_type = #tpu.core_type<tc>, window_params = [{transform_indices = @transform_0, window_bounds = array<i64: 32, 128>}, {pipeline_mode = #tpu.pipeline_mode<synchronous>, transform_indices = @transform_1, window_bounds = array<i64: 32, 32>}, {pipeline_mode = #tpu.pipeline_mode<synchronous>, transform_indices = @transform_2, window_bounds = array<i64: 32, 32>}, {pipeline_mode = #tpu.pipeline_mode<synchronous>, transform_indices = @transform_3, window_bounds = array<i64: 32, 1>}, {pipeline_mode = #tpu.pipeline_mode<synchronous>, transform_indices = @transform_4, window_bounds = array<i64: 32, 1>}, {transform_indices = @transform_5, window_bounds = array<i64: 32, 128>}]} {
    %c0 = arith.constant 0 : index
    %c0_0 = arith.constant 0 : index
    %0 = vector.load %arg1[%c0, %c0_0] : memref<32x128xf32, #tpu.memory_space<vmem>>, vector<32x128xf32>
    %c0_1 = arith.constant 0 : index
    %c0_2 = arith.constant 0 : index
    %1 = vector.load %arg2[%c0_1, %c0_2] : memref<32x32xf32, #tpu.memory_space<vmem>>, vector<32x32xf32>
    %cst = arith.constant dense<0.000000e+00> : vector<32x128xf32>
    %2 = tpu.matmul %1, %0, %cst {dimension_numbers = #tpu.dot_dimension_numbers<[1], [0], [0], [1], [0, 0, 1, 1], [], []>} : vector<32x32xf32>, vector<32x128xf32>, vector<32x128xf32> -> vector<32x128xf32>
    %c0_3 = arith.constant 0 : index
    %c0_4 = arith.constant 0 : index
    %3 = vector.load %arg3[%c0_3, %c0_4] : memref<32x32xf32, #tpu.memory_space<vmem>>, vector<32x32xf32>
    %cst_5 = arith.constant dense<0.000000e+00> : vector<32x128xf32>
    %4 = tpu.matmul %3, %0, %cst_5 {dimension_numbers = #tpu.dot_dimension_numbers<[1], [0], [0], [1], [0, 0, 1, 1], [], []>} : vector<32x32xf32>, vector<32x128xf32>, vector<32x128xf32> -> vector<32x128xf32>
    %c0_6 = arith.constant 0 : index
    %c0_7 = arith.constant 0 : index
    %5 = vector.load %arg4[%c0_6, %c0_7] : memref<32x1xf32, #tpu.memory_space<vmem>>, vector<32x1xf32>
    %6 = vector.broadcast %5 : vector<32x1xf32> to vector<32x128xf32>
    %7 = arith.addf %4, %6 : vector<32x128xf32>
    %cst_8 = arith.constant 5.000000e-01 : f32
    %8 = vector.broadcast %cst_8 : f32 to vector<32x128xf32>
    %9 = arith.mulf %8, %2 : vector<32x128xf32>
    %10 = math.tanh %9 : vector<32x128xf32>
    %cst_9 = arith.constant 1.000000e+00 : f32
    %11 = vector.broadcast %cst_9 : f32 to vector<32x128xf32>
    %12 = arith.addf %10, %11 : vector<32x128xf32>
    %cst_10 = arith.constant 5.000000e-01 : f32
    %13 = vector.broadcast %cst_10 : f32 to vector<32x128xf32>
    %14 = arith.mulf %13, %12 : vector<32x128xf32>
    %15 = math.tanh %7 : vector<32x128xf32>
    %c0_11 = arith.constant 0 : index
    %c0_12 = arith.constant 0 : index
    %16 = vector.load %arg5[%c0_11, %c0_12] : memref<32x1xf32, #tpu.memory_space<vmem>>, vector<32x1xf32>
    %17 = vector.broadcast %16 : vector<32x1xf32> to vector<32x128xf32>
    %18 = arith.mulf %17, %15 : vector<32x128xf32>
    %19 = arith.addf %14, %18 : vector<32x128xf32>
    %c0_13 = arith.constant 0 : index
    %c0_14 = arith.constant 0 : index
    %20 = vector.load %arg6[%c0_13, %c0_14] : memref<32x128xf32, #tpu.memory_space<vmem>>, vector<32x128xf32>
    tpu.vector_store %arg6[%c0_13, %c0_14], %19 {strides = array<i32>} : memref<32x128xf32, #tpu.memory_space<vmem>>, vector<32x128xf32>,
    return
  }
  func.func @transform_0(%arg0: i32) -> (i32, i32) {
    %c0_i32 = arith.constant 0 : i32
    %c0_i32_0 = arith.constant 0 : i32
    return %c0_i32, %arg0 : i32, i32
  }
  func.func @transform_1(%arg0: i32) -> (i32, i32) {
    %c0_i32 = arith.constant 0 : i32
    %c0_i32_0 = arith.constant 0 : i32
    %c0_i32_1 = arith.constant 0 : i32
    return %c0_i32, %c0_i32_0 : i32, i32
  }
  func.func @transform_2(%arg0: i32) -> (i32, i32) {
    %c0_i32 = arith.constant 0 : i32
    %c0_i32_0 = arith.constant 0 : i32
    %c0_i32_1 = arith.constant 0 : i32
    return %c0_i32, %c0_i32_0 : i32, i32
  }
  func.func @transform_3(%arg0: i32) -> (i32, i32) {
    %c0_i32 = arith.constant 0 : i32
    %c0_i32_0 = arith.constant 0 : i32
    %c0_i32_1 = arith.constant 0 : i32
    return %c0_i32, %c0_i32_0 : i32, i32
  }
  func.func @transform_4(%arg0: i32) -> (i32, i32) {
    %c0_i32 = arith.constant 0 : i32
    %c0_i32_0 = arith.constant 0 : i32
    %c0_i32_1 = arith.constant 0 : i32
    return %c0_i32, %c0_i32_0 : i32, i32
  }
  func.func @transform_5(%arg0: i32) -> (i32, i32) {
    %c0_i32 = arith.constant 0 : i32
    %c0_i32_0 = arith.constant 0 : i32
    return %c0_i32, %arg0 : i32, i32
  }
}

</mosaic_0001>

<bundles_post_ra>
// kernel: tpu_custom_call.1
= control target key start
LH: loop header
LB: loop body
LE: loop exit
PB: predicated region body
PF: predicated region fallthrough
CT: control target
= control target key end

     0   :  { %10 = vsyncpa [#allocation3], 0  ;;  %s426_s0 = inlined_call_operand.vmem [shape: f32[32,128], index: 0, kind: input, shape index: {}]   ;;  %s427_s1 = inlined_call_operand.vmem [shape: f32[32,32], index: 1, kind: input, shape index: {}]   ;;  %s428_s2 = inlined_call_operand.hbm [shape: f32[32,32], index: 2, kind: input, shape index: {}]   ;;  %s429_s3 = inlined_call_operand.vmem [shape: f32[32,1], index: 3, kind: input, shape index: {}]   ;;  %s430_s4 = inlined_call_operand.vmem [shape: f32[32,1], index: 4, kind: input, shape index: {}]   ;;  %s431_s5 = inlined_call_operand.hbm [shape: f32[32,128], index: 5, kind: output, shape index: {}]  }
   0x1   :  { %11 = vsyncpa [#allocation4], 0  ;;  %s20_s20 = sshll.u32 %s428_s2, 4  ;;  %s323_s21 = smov [#allocation2]   ;;  %s21_s20 = int_to_ptr.hbm [resolvable:$true] %s20_s20 }
   0x2   :  { %s22_s22 = sshll.u32 %s323_s21, 4  ;;  %s324_s23 = smov 128   ;;  %s23_s22 = int_to_ptr.vmem [resolvable:$true] %s22_s22 }
   0x3   :  { %s325_s24 = smov 8  }
   0x4   :  { %28 = dma.hbm_to_vmem [thread:$0]  %s21_s20, 512, %s23_s22, [#allocation3], %s324_s23, %s324_s23, %s325_s24  }
   0x5   :  { %319 = dma.done.wait [#allocation3], 512  }
   0x6   :  { %320 = vsyncadd [#allocation3], 4294966784  ;;  %v326_v0 = vmov 0   ;;  %v40_v1 = vld [vmem:[%s426_s0 + $0x18] sm:$0xff]  ;;  %v39_v2 = vld [vmem:[%s426_s0 + $0x10] sm:$0xff]  ;;  %vm45_vm0 = vcmask 261120  }
   0x7   :  { %253 = vset.pattern.permute.xlu1 %v326_v0  ;;  %252 = vset.pattern.permute.xlu0 %v326_v0  ;;  %v38_v3 = vld [vmem:[%s426_s0 + $0x8] sm:$0xff]  ;;  %v37_v4 = vld [vmem:[%s426_s0] sm:$0xff]  ;;  %v43_v6 = vld [vmem:[%s427_s1 + $0x10] sm:$0xff]  ;;  %s218_s7 = sshll.u32 %s431_s5, 4  ;;  %s219_s7 = int_to_ptr.hbm [resolvable:$true] %s218_s7 }
   0x8   :  { %254 = vset.pattern.permute.xlu2 %v326_v0  ;;  %70 = vmatpush.msra.mxu0 %v40_v1  ;;  %v41_v5 = vld [vmem:[%s427_s1] sm:$0xff]  ;;  %v89_v8 = vld [vmem:[#allocation2 + $0x10] sm:$0xff]  ;;  %v42_v12 = vld [vmem:[%s427_s1 + $0x8] sm:$0xff] }
   0x9   :  { %239 = vmatpush.msra.mxu2 %v40_v1  ;;  %139 = vmatpush.msra.mxu1 %v40_v1  ;;  %v87_v7 = vld [vmem:[#allocation2] sm:$0xff]  ;;  %v93_v9 = vld [vmem:[%s429_s3 + $0x10] sm:$0xff]  ;;  %v44_v13 = vld [vmem:[%s427_s1 + $0x18] sm:$0xff] }
   0xa   :  { %243 = vmatpush.msra.mxu3 %v40_v1  ;;  %71 = vmatpush.msra.mxu0 %v39_v2  ;;  %v91_v10 = vld [vmem:[%s429_s3] sm:$0xff]  ;;  %v88_v14 = vld [vmem:[#allocation2 + $0x8] sm:$0xff]  ;;  %v90_v15 = vld [vmem:[#allocation2 + $0x18] sm:$0xff] }
   0xb   :  { %240 = vmatpush.msra.mxu2 %v39_v2  ;;  %140 = vmatpush.msra.mxu1 %v39_v2  ;;  %v176_v11 = vld [vmem:[%s430_s4] sm:$0xff]  ;;  %v94_v16 = vld [vmem:[%s429_s3 + $0x18] sm:$0xff]  ;;  %v92_v17 = vld [vmem:[%s429_s3 + $0x8] sm:$0xff] }
   0xc   :  { %244 = vmatpush.msra.mxu3 %v39_v2  ;;  %72 = vmatpush.msra.mxu0 %v38_v3  ;;  %v177_v18 = vld [vmem:[%s430_s4 + $0x8] sm:$0xff]  ;;  %v179_v19 = vld [vmem:[%s430_s4 + $0x18] sm:$0xff]  ;;  %v178_v20 = vld [vmem:[%s430_s4 + $0x10] sm:$0xff]  ;;  %s327_s4 = smov [#allocation5]  }
   0xd   :  { %241 = vmatpush.msra.mxu2 %v38_v3  ;;  %141 = vmatpush.msra.mxu1 %v38_v3  ;;  %s216_s29 = sshll.u32 %s327_s4, 4  ;;  %s217_s29 = int_to_ptr.vmem [resolvable:$true] %s216_s29 }
   0xe   :  { %245 = vmatpush.msra.mxu3 %v38_v3  ;;  %73 = vmatpush.msra.mxu0 %v37_v4 }
   0xf   :  { %242 = vmatpush.msra.mxu2 %v37_v4  ;;  %142 = vmatpush.msra.mxu1 %v37_v4 }
  0x10   :  { %246 = vmatpush.msra.mxu3 %v37_v4  ;;  %231 = vmatmul.msk.f32.vlgmr.msra.gmra.mxu0 %vm45_vm0, %v41_v5 }
  0x11   :  { %233 = vmatmul.msk.f32.vlgmr.msra.gmra.mxu2 %vm45_vm0, %v43_v6  ;;  %235 = vmatmul.msk.f32.vlgmr.msra.gmra.mxu1 %vm45_vm0, %v87_v7 }
  0x12   :  { %237 = vmatmul.msk.f32.vlgmr.msra.gmra.mxu3 %vm45_vm0, %v89_v8  ;;  %107 = vperm.xlu1 %253, %v93_v9  }
  0x13   :  { %97 = vperm.xlu0 %252, %v91_v10   ;;  %182 = vperm.xlu2 %254, %v176_v11  }
  0x18   :  { %232 = vmatmul.msk.f32.gmra.mxu0 %vm45_vm0, %v42_v12 }
  0x19   :  { %234 = vmatmul.msk.f32.gmra.mxu2 %vm45_vm0, %v44_v13  ;;  %236 = vmatmul.msk.f32.gmra.mxu1 %vm45_vm0, %v88_v14 }
  0x1a   :  { %238 = vmatmul.msk.f32.gmra.mxu3 %vm45_vm0, %v90_v15  ;;  %112 = vperm.xlu1 %253, %v94_v16  }
  0x1b   :  { %102 = vperm.xlu0 %252, %v92_v17   ;;  %187 = vperm.xlu2 %254, %v177_v18  }
  0x22   :  { %197 = vperm.xlu1 %253, %v179_v19  }
  0x23   :  { %192 = vperm.xlu0 %252, %v178_v20  }
  0x6d   :  { %v183_v28 = vpop.permute.xlu2 %182 }
  0x75   :  { %v188_v53 = vpop.permute.xlu2 %187 }
  0x84   :  { %v108_v26 = vpop.permute.xlu1 %107 }
  0x85   :  { %v98_v21 = vpop.permute.xlu0 %97 }
  0x8c   :  { %v113_v45 = vpop.permute.xlu1 %112 }
  0x8d   :  { %v75_v22 = vpop.f32.mrf.mxu0  ;;  %v103_v29 = vpop.permute.xlu0 %102 }
  0x8e   :  { %v156_v23 = vmul.f32 0.5, %v75_v22  ;;  %v144_v24 = vpop.f32.mrf.mxu1 }
  0x8f   :  { %v145_v25 = vadd.f32 %v144_v24, %v98_v21 }
  0x90   :  { %255 = vtanh.f32 %v156_v23 }
  0x91   :  { %257 = vtanh.f32 %v145_v25 }
  0x94   :  { %v81_v27 = vpop.f32.mrf.mxu2  ;;  %v198_v1 = vpop.permute.xlu1 %197 }
  0x95   :  { %v158_v30 = vmul.f32 0.5, %v81_v27  ;;  %v150_v31 = vpop.f32.mrf.mxu3  ;;  %v78_v33 = vpop.f32.mrf.mxu0 }
  0x96   :  { %v151_v32 = vadd.f32 %v150_v31, %v108_v26  ;;  %v256_v34 = vpop.eup %255  ;;  %v157_v35 = vmul.f32 0.5, %v78_v33  ;;  %v147_v36 = vpop.f32.mrf.mxu1 }
  0x97   :  { %259 = vtanh.f32 %v158_v30  ;;  %v258_v37 = vpop.eup %257  ;;  %v164_v38 = vadd.f32 1.0, %v256_v34  ;;  %v148_v39 = vadd.f32 %v147_v36, %v103_v29  ;;  %v193_v52 = vpop.permute.xlu0 %192 }
  0x98   :  { %261 = vtanh.f32 %v151_v32  ;;  %v200_v40 = vmul.f32 %v258_v37, %v183_v28 }
  0x99   :  { %263 = vtanh.f32 %v157_v35  ;;  %v168_v41 = vmul.f32 0.5, %v164_v38 }
  0x9a   :  { %265 = vtanh.f32 %v148_v39 }
  0x9b   :  { %v204_v42 = vadd.f32 %v200_v40, %v168_v41 }
  0x9c   :  { %v84_v43 = vpop.f32.mrf.mxu2 }
  0x9d   :  { %v260_v44 = vpop.eup %259  ;;  %v159_v46 = vmul.f32 0.5, %v84_v43  ;;  %v153_v47 = vpop.f32.mrf.mxu3  ;;  %208 = vst [vmem:[#allocation5] sm:$0xff] %v204_v42 }
  0x9e   :  { %v262_v48 = vpop.eup %261  ;;  %v166_v49 = vadd.f32 1.0, %v260_v44  ;;  %v154_v50 = vadd.f32 %v153_v47, %v113_v45 }
  0x9f   :  { %v264_v51 = vpop.eup %263  ;;  %267 = vtanh.f32 %v159_v46  ;;  %v202_v56 = vmul.f32 %v262_v48, %v193_v52 }
  0xa0   :  { %v266_v54 = vpop.eup %265  ;;  %v170_v55 = vmul.f32 0.5, %v166_v49  ;;  %v165_v57 = vadd.f32 1.0, %v264_v51  ;;  %269 = vtanh.f32 %v154_v50 }
  0xa1   :  { %v201_v60 = vmul.f32 %v266_v54, %v188_v53 }
  0xa2   :  { %v206_v58 = vadd.f32 %v202_v56, %v170_v55  ;;  %v169_v59 = vmul.f32 0.5, %v165_v57 }
  0xa4   :  { %210 = vst [vmem:[#allocation5 + $0x10] sm:$0xff] %v206_v58  ;;  %v205_v61 = vadd.f32 %v201_v60, %v169_v59 }
  0xa5   :  { %v268_v62 = vpop.eup %267 }
  0xa6   :  { %v270_v63 = vpop.eup %269  ;;  %v167_v0 = vadd.f32 1.0, %v268_v62  ;;  %209 = vst [vmem:[#allocation5 + $0x8] sm:$0xff] %v205_v61 }
  0xa7   :  { %v203_v3 = vmul.f32 %v270_v63, %v198_v1 }
  0xa8   :  { %v171_v2 = vmul.f32 0.5, %v167_v0 }
  0xaa   :  { %v207_v4 = vadd.f32 %v203_v3, %v171_v2 }
  0xac   :  { %211 = vst [vmem:[#allocation5 + $0x18] sm:$0xff] %v207_v4 }
  0xad   :  { %224 = dma.vmem_to_hbm [thread:$0]  %s217_s29, 512, %s219_s7, [#allocation4], %s324_s23, %s324_s23, %s325_s24  }
  0xae   :  { %321 = dma.done.wait [#allocation4], 512  }
  0xaf   :  { %322 = vsyncadd [#allocation4], 4294966784 }
  0xb0   :  { %229 = vsyncpa [#allocation3], 1 }
  0xb1   :  { %230 = vsyncpa [#allocation4], 1 }

// kernel: tpu_custom_call.1
= control target key start
LH: loop header
LB: loop body
LE: loop exit
PB: predicated region body
PF: predicated region fallthrough
CT: control target
= control target key end

     0   :  { %10 = vsyncpa [#allocation3], 0  ;;  %s426_s0 = inlined_call_operand.vmem [shape: f32[32,128], index: 0, kind: input, shape index: {}]   ;;  %s427_s1 = inlined_call_operand.vmem [shape: f32[32,32], index: 1, kind: input, shape index: {}]   ;;  %s428_s2 = inlined_call_operand.hbm [shape: f32[32,32], index: 2, kind: input, shape index: {}]   ;;  %s429_s3 = inlined_call_operand.vmem [shape: f32[32,1], index: 3, kind: input, shape index: {}]   ;;  %s430_s4 = inlined_call_operand.vmem [shape: f32[32,1], index: 4, kind: input, shape index: {}]   ;;  %s431_s5 = inlined_call_operand.hbm [shape: f32[32,128], index: 5, kind: output, shape index: {}]  }
   0x1   :  { %11 = vsyncpa [#allocation4], 0  ;;  %s20_s20 = sshll.u32 %s428_s2, 4  ;;  %s323_s21 = smov [#allocation2]   ;;  %s21_s20 = int_to_ptr.hbm [resolvable:$true] %s20_s20 }
   0x2   :  { %s22_s22 = sshll.u32 %s323_s21, 4  ;;  %s324_s23 = smov 128   ;;  %s23_s22 = int_to_ptr.vmem [resolvable:$true] %s22_s22 }
   0x3   :  { %s325_s24 = smov 8  }
   0x4   :  { %28 = dma.hbm_to_vmem [thread:$0]  %s21_s20, 512, %s23_s22, [#allocation3], %s324_s23, %s324_s23, %s325_s24  }
   0x5   :  { %319 = dma.done.wait [#allocation3], 512  }
   0x6   :  { %320 = vsyncadd [#allocation3], 4294966784  ;;  %v326_v0 = vmov 0   ;;  %v40_v1 = vld [vmem:[%s426_s0 + $0x18] sm:$0xff]  ;;  %v39_v2 = vld [vmem:[%s426_s0 + $0x10] sm:$0xff]  ;;  %vm45_vm0 = vcmask 261120  }
   0x7   :  { %253 = vset.pattern.permute.xlu1 %v326_v0  ;;  %252 = vset.pattern.permute.xlu0 %v326_v0  ;;  %v38_v3 = vld [vmem:[%s426_s0 + $0x8] sm:$0xff]  ;;  %v37_v4 = vld [vmem:[%s426_s0] sm:$0xff]  ;;  %v43_v6 = vld [vmem:[%s427_s1 + $0x10] sm:$0xff]  ;;  %s218_s7 = sshll.u32 %s431_s5, 4  ;;  %s219_s7 = int_to_ptr.hbm [resolvable:$true] %s218_s7 }
   0x8   :  { %254 = vset.pattern.permute.xlu2 %v326_v0  ;;  %70 = vmatpush.msra.mxu0 %v40_v1  ;;  %v41_v5 = vld [vmem:[%s427_s1] sm:$0xff]  ;;  %v89_v8 = vld [vmem:[#allocation2 + $0x10] sm:$0xff]  ;;  %v42_v12 = vld [vmem:[%s427_s1 + $0x8] sm:$0xff] }
   0x9   :  { %239 = vmatpush.msra.mxu2 %v40_v1  ;;  %139 = vmatpush.msra.mxu1 %v40_v1  ;;  %v87_v7 = vld [vmem:[#allocation2] sm:$0xff]  ;;  %v93_v9 = vld [vmem:[%s429_s3 + $0x10] sm:$0xff]  ;;  %v44_v13 = vld [vmem:[%s427_s1 + $0x18] sm:$0xff] }
   0xa   :  { %243 = vmatpush.msra.mxu3 %v40_v1  ;;  %71 = vmatpush.msra.mxu0 %v39_v2  ;;  %v91_v10 = vld [vmem:[%s429_s3] sm:$0xff]  ;;  %v88_v14 = vld [vmem:[#allocation2 + $0x8] sm:$0xff]  ;;  %v90_v15 = vld [vmem:[#allocation2 + $0x18] sm:$0xff] }
   0xb   :  { %240 = vmatpush.msra.mxu2 %v39_v2  ;;  %140 = vmatpush.msra.mxu1 %v39_v2  ;;  %v176_v11 = vld [vmem:[%s430_s4] sm:$0xff]  ;;  %v94_v16 = vld [vmem:[%s429_s3 + $0x18] sm:$0xff]  ;;  %v92_v17 = vld [vmem:[%s429_s3 + $0x8] sm:$0xff] }
   0xc   :  { %244 = vmatpush.msra.mxu3 %v39_v2  ;;  %72 = vmatpush.msra.mxu0 %v38_v3  ;;  %v177_v18 = vld [vmem:[%s430_s4 + $0x8] sm:$0xff]  ;;  %v179_v19 = vld [vmem:[%s430_s4 + $0x18] sm:$0xff]  ;;  %v178_v20 = vld [vmem:[%s430_s4 + $0x10] sm:$0xff]  ;;  %s327_s4 = smov [#allocation5]  }
   0xd   :  { %241 = vmatpush.msra.mxu2 %v38_v3  ;;  %141 = vmatpush.msra.mxu1 %v38_v3  ;;  %s216_s29 = sshll.u32 %s327_s4, 4  ;;  %s217_s29 = int_to_ptr.vmem [resolvable:$true] %s216_s29 }
   0xe   :  { %245 = vmatpush.msra.mxu3 %v38_v3  ;;  %73 = vmatpush.msra.mxu0 %v37_v4 }
   0xf   :  { %242 = vmatpush.msra.mxu2 %v37_v4  ;;  %142 = vmatpush.msra.mxu1 %v37_v4 }
  0x10   :  { %246 = vmatpush.msra.mxu3 %v37_v4  ;;  %231 = vmatmul.msk.f32.vlgmr.msra.gmra.mxu0 %vm45_vm0, %v41_v5 }
  0x11   :  { %233 = vmatmul.msk.f32.vlgmr.msra.gmra.mxu2 %vm45_vm0, %v43_v6  ;;  %235 = vmatmul.msk.f32.vlgmr.msra.gmra.mxu1 %vm45_vm0, %v87_v7 }
  0x12   :  { %237 = vmatmul.msk.f32.vlgmr.msra.gmra.mxu3 %vm45_vm0, %v89_v8  ;;  %107 = vperm.xlu1 %253, %v93_v9  }
  0x13   :  { %97 = vperm.xlu0 %252, %v91_v10   ;;  %182 = vperm.xlu2 %254, %v176_v11  }
  0x18   :  { %232 = vmatmul.msk.f32.gmra.mxu0 %vm45_vm0, %v42_v12 }
  0x19   :  { %234 = vmatmul.msk.f32.gmra.mxu2 %vm45_vm0, %v44_v13  ;;  %236 = vmatmul.msk.f32.gmra.mxu1 %vm45_vm0, %v88_v14 }
  0x1a   :  { %238 = vmatmul.msk.f32.gmra.mxu3 %vm45_vm0, %v90_v15  ;;  %112 = vperm.xlu1 %253, %v94_v16  }
  0x1b   :  { %102 = vperm.xlu0 %252, %v92_v17   ;;  %187 = vperm.xlu2 %254, %v177_v18  }
  0x22   :  { %197 = vperm.xlu1 %253, %v179_v19  }
  0x23   :  { %192 = vperm.xlu0 %252, %v178_v20  }
  0x6d   :  { %v183_v28 = vpop.permute.xlu2 %182 }
  0x75   :  { %v188_v53 = vpop.permute.xlu2 %187 }
  0x84   :  { %v108_v26 = vpop.permute.xlu1 %107 }
  0x85   :  { %v98_v21 = vpop.permute.xlu0 %97 }
  0x8c   :  { %v113_v45 = vpop.permute.xlu1 %112 }
  0x8d   :  { %v75_v22 = vpop.f32.mrf.mxu0  ;;  %v103_v29 = vpop.permute.xlu0 %102 }
  0x8e   :  { %v156_v23 = vmul.f32 0.5, %v75_v22  ;;  %v144_v24 = vpop.f32.mrf.mxu1 }
  0x8f   :  { %v145_v25 = vadd.f32 %v144_v24, %v98_v21 }
  0x90   :  { %255 = vtanh.f32 %v156_v23 }
  0x91   :  { %257 = vtanh.f32 %v145_v25 }
  0x94   :  { %v81_v27 = vpop.f32.mrf.mxu2  ;;  %v198_v1 = vpop.permute.xlu1 %197 }
  0x95   :  { %v158_v30 = vmul.f32 0.5, %v81_v27  ;;  %v150_v31 = vpop.f32.mrf.mxu3  ;;  %v78_v33 = vpop.f32.mrf.mxu0 }
  0x96   :  { %v151_v32 = vadd.f32 %v150_v31, %v108_v26  ;;  %v256_v34 = vpop.eup %255  ;;  %v157_v35 = vmul.f32 0.5, %v78_v33  ;;  %v147_v36 = vpop.f32.mrf.mxu1 }
  0x97   :  { %259 = vtanh.f32 %v158_v30  ;;  %v258_v37 = vpop.eup %257  ;;  %v164_v38 = vadd.f32 1.0, %v256_v34  ;;  %v148_v39 = vadd.f32 %v147_v36, %v103_v29  ;;  %v193_v52 = vpop.permute.xlu0 %192 }
  0x98   :  { %261 = vtanh.f32 %v151_v32  ;;  %v200_v40 = vmul.f32 %v258_v37, %v183_v28 }
  0x99   :  { %263 = vtanh.f32 %v157_v35  ;;  %v168_v41 = vmul.f32 0.5, %v164_v38 }
  0x9a   :  { %265 = vtanh.f32 %v148_v39 }
  0x9b   :  { %v204_v42 = vadd.f32 %v200_v40, %v168_v41 }
  0x9c   :  { %v84_v43 = vpop.f32.mrf.mxu2 }
  0x9d   :  { %v260_v44 = vpop.eup %259  ;;  %v159_v46 = vmul.f32 0.5, %v84_v43  ;;  %v153_v47 = vpop.f32.mrf.mxu3  ;;  %208 = vst [vmem:[#allocation5] sm:$0xff] %v204_v42 }
  0x9e   :  { %v262_v48 = vpop.eup %261  ;;  %v166_v49 = vadd.f32 1.0, %v260_v44  ;;  %v154_v50 = vadd.f32 %v153_v47, %v113_v45 }
  0x9f   :  { %v264_v51 = vpop.eup %263  ;;  %267 = vtanh.f32 %v159_v46  ;;  %v202_v56 = vmul.f32 %v262_v48, %v193_v52 }
  0xa0   :  { %v266_v54 = vpop.eup %265  ;;  %v170_v55 = vmul.f32 0.5, %v166_v49  ;;  %v165_v57 = vadd.f32 1.0, %v264_v51  ;;  %269 = vtanh.f32 %v154_v50 }
  0xa1   :  { %v201_v60 = vmul.f32 %v266_v54, %v188_v53 }
  0xa2   :  { %v206_v58 = vadd.f32 %v202_v56, %v170_v55  ;;  %v169_v59 = vmul.f32 0.5, %v165_v57 }
  0xa4   :  { %210 = vst [vmem:[#allocation5 + $0x10] sm:$0xff] %v206_v58  ;;  %v205_v61 = vadd.f32 %v201_v60, %v169_v59 }
  0xa5   :  { %v268_v62 = vpop.eup %267 }
  0xa6   :  { %v270_v63 = vpop.eup %269  ;;  %v167_v0 = vadd.f32 1.0, %v268_v62  ;;  %209 = vst [vmem:[#allocation5 + $0x8] sm:$0xff] %v205_v61 }
  0xa7   :  { %v203_v3 = vmul.f32 %v270_v63, %v198_v1 }
  0xa8   :  { %v171_v2 = vmul.f32 0.5, %v167_v0 }
  0xaa   :  { %v207_v4 = vadd.f32 %v203_v3, %v171_v2 }
  0xac   :  { %211 = vst [vmem:[#allocation5 + $0x18] sm:$0xff] %v207_v4 }
  0xad   :  { %224 = dma.vmem_to_hbm [thread:$0]  %s217_s29, 512, %s219_s7, [#allocation4], %s324_s23, %s324_s23, %s325_s24  }
  0xae   :  { %321 = dma.done.wait [#allocation4], 512  }
  0xaf   :  { %322 = vsyncadd [#allocation4], 4294966784 }
  0xb0   :  { %229 = vsyncpa [#allocation3], 1 }
  0xb1   :  { %230 = vsyncpa [#allocation4], 1 }

</bundles_post_ra>
